<compile_context>
chip_gen: v5e
topology: v5e:2x2
jax: 0.10.0
libtpu: 0.0.40
codegen_flags: <defaults>
</compile_context>

<pallas_src>
import jax
import jax.numpy as jnp
from jax.experimental import pallas as pl
from jax.experimental.pallas import tpu as pltpu


def _round_up(x, m):
    return ((x + m - 1) // m) * m


def _sublane_multiple(dtype):
    # min sublane tile: 8 for 4-byte, 16 for 2-byte, 32 for 1-byte dtypes.
    return {4: 8, 2: 16, 1: 32}.get(jnp.dtype(dtype).itemsize, 8)


def _vmem_bytes_estimate(tn, in_f, out_f, T, x_bytes, w_bytes, out_bytes):
    lane = 128
    in_l = _round_up(in_f, lane)
    out_l = _round_up(out_f, lane)
    total = 0
    total += 2 * tn * in_l * x_bytes            # x row block, double-buffered
    total += 2 * tn * lane * 4                  # (tn, 1) int32 edge types, lane-padded
    total += 2 * tn * out_l * out_bytes         # output row block, double-buffered
    total += T * _round_up(in_f, 8) * out_l * w_bytes   # resident weights (1 buffer)
    total += T * 8 * out_l * 4                  # resident bias
    total += 4 * tn * out_l * 4                 # live f32 intermediates (y_t / acc / relu)
    return total


def _resident_block_spec(block_shape, index_map):
    # Constant-index blocks (weights/bias) are fetched once; single-buffer them to
    # save VMEM (default double-buffering allocates 2x).  Fall back cleanly on
    # Pallas versions without pipeline_mode / Buffered.
    try:
        return pl.BlockSpec(block_shape, index_map, pipeline_mode=pl.Buffered(1))
    except (TypeError, AttributeError):
        return pl.BlockSpec(block_shape, index_map)


def _make_kernel(type_ids, compute_dtype):
    type_ids = tuple(int(t) for t in type_ids)   # static module config -> immediates

    def kernel(x_ref, et_ref, w_ref, b_ref, o_ref):
        x = x_ref[...].astype(compute_dtype)      # in-register cast; bf16 MXU, no HBM cost
        et = et_ref[...]                          # (tn, 1) int32
        acc = jnp.zeros(o_ref.shape, jnp.float32)  # unmatched-type rows stay exactly zero
        for t, tid in enumerate(type_ids):        # T is a small static constant (unrolled)
            # Per-type dot, immediately folded into the accumulator: no wide
            # (tn, T*out_f) intermediate ever materializes in VMEM.
            y_t = jnp.dot(x, w_ref[t], preferred_element_type=jnp.float32)  # (tn, out_f)
            y_t = y_t + b_ref[t]                  # (tn, out_f) + (1, out_f)
            acc = jnp.where(et == tid, y_t, acc)  # per-row type select
        # Single ReLU + single writeback; zero rows stay zero through the max.
        o_ref[...] = jnp.maximum(acc, 0.0).astype(o_ref.dtype)

    return kernel


def edge_feats_linear(edge_features, edge_types, weights, biases, type_ids, *,
                      tn=1024, compute_dtype=jnp.bfloat16, out_dtype=None,
                      vmem_budget_bytes=40 * 1024 * 1024):
    """Per-edge-type Linear + ReLU (EdgeFeatsLinear forward, num_layers=1).

    edge_features: (N, in_f); edge_types: (N,) int
    weights: (T, in_f, out_f)   (transpose of nn.Linear's (out, in) weight)
    biases : (T, out_f)
    type_ids: static sequence of T ints (the module's edge_types config).
    Rows whose edge type matches no entry of type_ids come out as zeros.
    """
    N, in_f = edge_features.shape
    T, _, out_f = weights.shape
    out_dtype = jnp.float32 if out_dtype is None else out_dtype

    # --- row tiling (no padding of x / edge_types; ragged last block is masked) ---
    sub = _sublane_multiple(edge_features.dtype)
    tn = max(sub, _round_up(min(tn, N), sub))
    if N >= 1024:
        # >=2 row blocks so the "parallel" axis can shard across v7x's 2 TensorCores.
        tn = min(tn, _round_up(pl.cdiv(N, 2), sub))
    x_bytes = jnp.dtype(edge_features.dtype).itemsize
    w_bytes = jnp.dtype(compute_dtype).itemsize
    o_bytes = jnp.dtype(out_dtype).itemsize
    while tn > sub and _vmem_bytes_estimate(tn, in_f, out_f, T,
                                            x_bytes, w_bytes, o_bytes) > vmem_budget_bytes:
        tn = max(sub, _round_up(tn // 2, sub))
    n_blocks = pl.cdiv(N, tn)
    vmem_est = _vmem_bytes_estimate(tn, in_f, out_f, T, x_bytes, w_bytes, o_bytes)
    # Sized from the real footprint; floor at 32 MiB, cap at 56 MiB (< v7x's 64 MiB).
    vmem_limit = int(min(max(vmem_est + (16 << 20), 32 << 20), 56 << 20))

    # Tiny, VMEM-resident per-type params (weights in compute dtype, bias stays f32).
    w = weights.astype(compute_dtype)                       # (T, in_f, out_f)
    b = biases.astype(jnp.float32).reshape(T, 1, out_f)     # (T, 1, out_f)
    et2d = edge_types.astype(jnp.int32).reshape(N, 1)       # metadata reshape only

    out = pl.pallas_call(
        _make_kernel(type_ids, compute_dtype),
        out_shape=jax.ShapeDtypeStruct((N, out_f), out_dtype),
        grid_spec=pltpu.PrefetchScalarGridSpec(
            num_scalar_prefetch=0,
            grid=(n_blocks,),
            in_specs=[
                pl.BlockSpec((tn, in_f), lambda i: (i, 0)),
                pl.BlockSpec((tn, 1), lambda i: (i, 0)),
                # constant-index, single-buffered, VMEM-resident params
                _resident_block_spec((T, in_f, out_f), lambda i: (0, 0, 0)),
                _resident_block_spec((T, 1, out_f), lambda i: (0, 0, 0)),
            ],
            out_specs=pl.BlockSpec((tn, out_f), lambda i: (i, 0)),
        ),
        compiler_params=pltpu.CompilerParams(
            dimension_semantics=("parallel",),
            vmem_limit_bytes=vmem_limit),
    )(edge_features, et2d, w, b)

    return out


def reference(edge_features, edge_types, weights, biases, type_ids):
    N = edge_features.shape[0]
    out_f = weights.shape[-1]
    out = jnp.zeros((N, out_f), jnp.float32)
    for t, tid in enumerate(type_ids):
        y = jnp.maximum(edge_features.astype(jnp.float32) @ weights[t].astype(jnp.float32)
                        + biases[t][None, :], 0.0)
        out = jnp.where((edge_types == int(tid))[:, None], y, out)
    return out


if __name__ == "__main__":
    N, in_f, out_f = 100, 32, 64              # N not a multiple of 8: exercises ragged block
    type_ids = (0, 1, 2)                      # static module config
    T = len(type_ids)

    key = jax.random.PRNGKey(0)
    k_x, k_t, k_w, k_b = jax.random.split(key, 4)

    edge_features = jax.random.normal(k_x, (N, in_f), dtype=jnp.float32)
    # Some rows get type 3, which is NOT in the table -> those rows must stay zero.
    edge_types = jax.random.randint(k_t, (N,), 0, T + 1, dtype=jnp.int32)
    weights = 0.1 * jax.random.normal(k_w, (T, in_f, out_f), dtype=jnp.float32)
    biases = 0.1 * jax.random.normal(k_b, (T, out_f), dtype=jnp.float32)

    ref_f32 = reference(edge_features, edge_types, weights, biases, type_ids)
    # bf16-compute reference (f32 accumulation), for the default kernel path.
    ref_bf16 = reference(edge_features.astype(jnp.bfloat16).astype(jnp.float32),
                         edge_types,
                         weights.astype(jnp.bfloat16).astype(jnp.float32),
                         biases, type_ids)

    # Default path: bf16 compute, single ragged row block.
    out = edge_feats_linear(edge_features, edge_types, weights, biases, type_ids)
    out = jax.block_until_ready(out)
    assert out.shape == (N, out_f)
    assert jnp.allclose(out, ref_bf16, atol=1e-3, rtol=1e-3), "bf16 path mismatch"
    assert jnp.allclose(out, ref_f32, atol=5e-2, rtol=5e-2), "bf16 path far from f32 ref"
    unknown = (edge_types >= T)[:, None]
    assert bool(jnp.all(jnp.where(unknown, out, 0.0) == 0.0)), "unknown-type rows not zero"

    # Multi-block + ragged last block + f32 compute path.
    out32 = edge_feats_linear(edge_features, edge_types, weights, biases, type_ids,
                              tn=64, compute_dtype=jnp.float32)
    out32 = jax.block_until_ready(out32)
    assert jnp.allclose(out32, ref_f32, atol=1e-5, rtol=1e-5), "f32 path mismatch"

    print("KERNEL_OK")
</pallas_src>

<mosaic_0001>
module attributes {stable_mosaic.version = 11 : i64} {
  func.func @kernel(%arg0: i32, %arg1: memref<104x32xf32, #tpu.memory_space<vmem>>, %arg2: memref<104x1xi32, #tpu.memory_space<vmem>>, %arg3: memref<3x32x64xbf16, #tpu.memory_space<vmem>>, %arg4: memref<3x1x64xf32, #tpu.memory_space<vmem>>, %arg5: memref<104x64xf32, #tpu.memory_space<vmem>>) attributes {dimension_semantics = [#tpu.dimension_semantics<parallel>], iteration_bounds = array<i64: 1>, scalar_prefetch = 0 : i64, scratch_operands = 0 : i64, tpu.core_type = #tpu.core_type<tc>, window_params = [{transform_indices = @transform_0, window_bounds = array<i64: 104, 32>}, {transform_indices = @transform_1, window_bounds = array<i64: 104, 1>}, {pipeline_mode = #tpu.pipeline_mode<synchronous>, transform_indices = @transform_2, window_bounds = array<i64: 3, 32, 64>}, {pipeline_mode = #tpu.pipeline_mode<synchronous>, transform_indices = @transform_3, window_bounds = array<i64: 3, 1, 64>}, {transform_indices = @transform_4, window_bounds = array<i64: 104, 64>}]} {
    %c0 = arith.constant 0 : index
    %c0_0 = arith.constant 0 : index
    %0 = vector.load %arg1[%c0, %c0_0] : memref<104x32xf32, #tpu.memory_space<vmem>>, vector<104x32xf32>
    %1 = arith.truncf %0 : vector<104x32xf32> to vector<104x32xbf16>
    %c0_1 = arith.constant 0 : index
    %c0_2 = arith.constant 0 : index
    %2 = vector.load %arg2[%c0_1, %c0_2] : memref<104x1xi32, #tpu.memory_space<vmem>>, vector<104x1xi32>
    %cst = arith.constant 0.000000e+00 : f32
    %3 = vector.broadcast %cst : f32 to vector<104x64xf32>
    %c0_3 = arith.constant 0 : index
    %c0_4 = arith.constant 0 : index
    %c0_5 = arith.constant 0 : index
    %4 = vector.load %arg3[%c0_3, %c0_4, %c0_5] : memref<3x32x64xbf16, #tpu.memory_space<vmem>>, vector<1x32x64xbf16>
    %5 = vector.shape_cast %4 : vector<1x32x64xbf16> to vector<32x64xbf16>
    %cst_6 = arith.constant dense<0.000000e+00> : vector<104x64xf32>
    %6 = tpu.matmul %1, %5, %cst_6 {dimension_numbers = #tpu.dot_dimension_numbers<[1], [0], [0], [1], [0, 0, 1, 1], [], []>} : vector<104x32xbf16>, vector<32x64xbf16>, vector<104x64xf32> -> vector<104x64xf32>
    %c0_7 = arith.constant 0 : index
    %c0_8 = arith.constant 0 : index
    %c0_9 = arith.constant 0 : index
    %7 = vector.load %arg4[%c0_7, %c0_8, %c0_9] : memref<3x1x64xf32, #tpu.memory_space<vmem>>, vector<1x1x64xf32>
    %8 = vector.shape_cast %7 : vector<1x1x64xf32> to vector<1x64xf32>
    %9 = vector.broadcast %8 : vector<1x64xf32> to vector<104x64xf32>
    %10 = arith.addf %6, %9 : vector<104x64xf32>
    %c0_i32 = arith.constant 0 : i32
    %11 = vector.broadcast %c0_i32 : i32 to vector<104x1xi32>
    %12 = arith.cmpi eq, %2, %11 : vector<104x1xi32>
    %13 = vector.shape_cast %12 : vector<104x1xi1> to vector<104x1xi1>
    %14 = vector.broadcast %13 : vector<104x1xi1> to vector<104x64xi1>
    %15 = arith.select %14, %10, %3 : vector<104x64xi1>, vector<104x64xf32>
    %c1 = arith.constant 1 : index
    %c0_10 = arith.constant 0 : index
    %c0_11 = arith.constant 0 : index
    %16 = vector.load %arg3[%c1, %c0_10, %c0_11] : memref<3x32x64xbf16, #tpu.memory_space<vmem>>, vector<1x32x64xbf16>
    %17 = vector.shape_cast %16 : vector<1x32x64xbf16> to vector<32x64xbf16>
    %cst_12 = arith.constant dense<0.000000e+00> : vector<104x64xf32>
    %18 = tpu.matmul %1, %17, %cst_12 {dimension_numbers = #tpu.dot_dimension_numbers<[1], [0], [0], [1], [0, 0, 1, 1], [], []>} : vector<104x32xbf16>, vector<32x64xbf16>, vector<104x64xf32> -> vector<104x64xf32>
    %c1_13 = arith.constant 1 : index
    %c0_14 = arith.constant 0 : index
    %c0_15 = arith.constant 0 : index
    %19 = vector.load %arg4[%c1_13, %c0_14, %c0_15] : memref<3x1x64xf32, #tpu.memory_space<vmem>>, vector<1x1x64xf32>
    %20 = vector.shape_cast %19 : vector<1x1x64xf32> to vector<1x64xf32>
    %21 = vector.broadcast %20 : vector<1x64xf32> to vector<104x64xf32>
    %22 = arith.addf %18, %21 : vector<104x64xf32>
    %c1_i32 = arith.constant 1 : i32
    %23 = vector.broadcast %c1_i32 : i32 to vector<104x1xi32>
    %24 = arith.cmpi eq, %2, %23 : vector<104x1xi32>
    %25 = vector.shape_cast %24 : vector<104x1xi1> to vector<104x1xi1>
    %26 = vector.broadcast %25 : vector<104x1xi1> to vector<104x64xi1>
    %27 = arith.select %26, %22, %15 : vector<104x64xi1>, vector<104x64xf32>
    %c2 = arith.constant 2 : index
    %c0_16 = arith.constant 0 : index
    %c0_17 = arith.constant 0 : index
    %28 = vector.load %arg3[%c2, %c0_16, %c0_17] : memref<3x32x64xbf16, #tpu.memory_space<vmem>>, vector<1x32x64xbf16>
    %29 = vector.shape_cast %28 : vector<1x32x64xbf16> to vector<32x64xbf16>
    %cst_18 = arith.constant dense<0.000000e+00> : vector<104x64xf32>
    %30 = tpu.matmul %1, %29, %cst_18 {dimension_numbers = #tpu.dot_dimension_numbers<[1], [0], [0], [1], [0, 0, 1, 1], [], []>} : vector<104x32xbf16>, vector<32x64xbf16>, vector<104x64xf32> -> vector<104x64xf32>
    %c2_19 = arith.constant 2 : index
    %c0_20 = arith.constant 0 : index
    %c0_21 = arith.constant 0 : index
    %31 = vector.load %arg4[%c2_19, %c0_20, %c0_21] : memref<3x1x64xf32, #tpu.memory_space<vmem>>, vector<1x1x64xf32>
    %32 = vector.shape_cast %31 : vector<1x1x64xf32> to vector<1x64xf32>
    %33 = vector.broadcast %32 : vector<1x64xf32> to vector<104x64xf32>
    %34 = arith.addf %30, %33 : vector<104x64xf32>
    %c2_i32 = arith.constant 2 : i32
    %35 = vector.broadcast %c2_i32 : i32 to vector<104x1xi32>
    %36 = arith.cmpi eq, %2, %35 : vector<104x1xi32>
    %37 = vector.shape_cast %36 : vector<104x1xi1> to vector<104x1xi1>
    %38 = vector.broadcast %37 : vector<104x1xi1> to vector<104x64xi1>
    %39 = arith.select %38, %34, %27 : vector<104x64xi1>, vector<104x64xf32>
    %cst_22 = arith.constant 0.000000e+00 : f32
    %40 = vector.broadcast %cst_22 : f32 to vector<104x64xf32>
    %41 = arith.maximumf %39, %40 : vector<104x64xf32>
    %c0_23 = arith.constant 0 : index
    %c0_24 = arith.constant 0 : index
    %42 = vector.load %arg5[%c0_23, %c0_24] : memref<104x64xf32, #tpu.memory_space<vmem>>, vector<104x64xf32>
    tpu.vector_store %arg5[%c0_23, %c0_24], %41 {strides = array<i32>} : memref<104x64xf32, #tpu.memory_space<vmem>>, vector<104x64xf32>,
    return
  }
  func.func @transform_0(%arg0: i32) -> (i32, i32) {
    %c0_i32 = arith.constant 0 : i32
    %c0_i32_0 = arith.constant 0 : i32
    return %arg0, %c0_i32 : i32, i32
  }
  func.func @transform_1(%arg0: i32) -> (i32, i32) {
    %c0_i32 = arith.constant 0 : i32
    %c0_i32_0 = arith.constant 0 : i32
    return %arg0, %c0_i32 : i32, i32
  }
  func.func @transform_2(%arg0: i32) -> (i32, i32, i32) {
    %c0_i32 = arith.constant 0 : i32
    %c0_i32_0 = arith.constant 0 : i32
    %c0_i32_1 = arith.constant 0 : i32
    %c0_i32_2 = arith.constant 0 : i32
    return %c0_i32, %c0_i32_0, %c0_i32_1 : i32, i32, i32
  }
  func.func @transform_3(%arg0: i32) -> (i32, i32, i32) {
    %c0_i32 = arith.constant 0 : i32
    %c0_i32_0 = arith.constant 0 : i32
    %c0_i32_1 = arith.constant 0 : i32
    %c0_i32_2 = arith.constant 0 : i32
    return %c0_i32, %c0_i32_0, %c0_i32_1 : i32, i32, i32
  }
  func.func @transform_4(%arg0: i32) -> (i32, i32) {
    %c0_i32 = arith.constant 0 : i32
    %c0_i32_0 = arith.constant 0 : i32
    return %arg0, %c0_i32 : i32, i32
  }
}

</mosaic_0001>

<bundles_post_ra>
// kernel: tpu_custom_call.1
= control target key start
LH: loop header
LB: loop body
LE: loop exit
PB: predicated region body
PF: predicated region fallthrough
CT: control target
= control target key end

     0   :  { %v644_v0 = vmov 0   ;;  %vm71_vm3 = vcmask 261120   ;;  %s1101_s2 = inlined_call_operand.vmem [shape: bf16[3,32,64], index: 2, kind: input, shape index: {}]   ;;  %s1102_s1 = inlined_call_operand.vmem [shape: s32[100,1], index: 1, kind: input, shape index: {}]   ;;  %s1103_s0 = inlined_call_operand.vmem [shape: f32[100,32], index: 0, kind: input, shape index: {}]   ;;  %s1104_s3 = inlined_call_operand.vmem [shape: f32[3,1,64], index: 3, kind: input, shape index: {}]   ;;  %s1105_s4 = inlined_call_operand.vmem [shape: f32[100,64], index: 4, kind: output, shape index: {}]  }
   0x1   :  { %640 = vset.pattern.permute.xlu2 %v644_v0  ;;  %639 = vset.pattern.permute.xlu1 %v644_v0  ;;  %v626_v1 = vld [vmem:[%s1101_s2 + $0x8] sm:$0xff]  ;;  %v628_v2 = vld [vmem:[%s1101_s2 + $0x18] sm:$0xff]  ;;  %v685_v4 = vld [vmem:[%s1102_s1 + $0x20] sm:$0xff] }
   0x2   :  { %v630_v3 = vld [vmem:[%s1101_s2 + $0x28] sm:$0xff]  ;;  %638 = vset.pattern.permute.xlu0 %v644_v0  ;;  %v690_v5 = vld [vmem:[%s1102_s1 + $0x10] sm:$0xff]  ;;  %v695_v6 = vld [vmem:[%s1102_s1] sm:$0xff]  ;;  %99 = vmatpush.bf16.msra.mxu0 %v626_v1  ;;  %vm140_vm0 = vcmp.eq.s32.totalorder %v685_v4, 0 }
   0x3   :  { %631 = vmatpush.bf16.msra.mxu3 %v626_v1  ;;  %vm138_vm1 = vcmp.eq.s32.totalorder %v690_v5, 0  ;;  %vm136_vm2 = vcmp.eq.s32.totalorder %v695_v6, 0  ;;  %v625_v7 = vld [vmem:[%s1101_s2] sm:$0xff]  ;;  %v627_v8 = vld [vmem:[%s1101_s2 + $0x10] sm:$0xff]  ;;  %633 = vmatpush.bf16.msra.mxu1 %v628_v2  ;;  %v153_v10 = vsel %vm140_vm0, 1, %v644_v0  ;;  %v19_v14 = vld [vmem:[%s1103_s0 + $0x8] sm:$0xff] }
   0x4   :  { %v629_v9 = vld [vmem:[%s1101_s2 + $0x20] sm:$0xff]  ;;  %635 = vmatpush.bf16.msra.mxu2 %v630_v3  ;;  %v151_v11 = vsel %vm138_vm1, 1, %v644_v0  ;;  %v149_v12 = vsel %vm136_vm2, 1, %v644_v0  ;;  %v20_v15 = vld [vmem:[%s1103_s0 + $0x10] sm:$0xff]  ;;  %175 = vperm.xlu2 %640, %v153_v10   ;;  %v21_v16 = vld [vmem:[%s1103_s0 + $0x18] sm:$0xff]  ;;  %vm292_vm14 = vcmp.eq.s32.totalorder %v695_v6, 1 }
   0x5   :  { %v18_v13 = vld [vmem:[%s1103_s0] sm:$0xff]  ;;  %169 = vperm.xlu1 %639, %v151_v11   ;;  %v727_v17 = vld [vmem:[%s1102_s1 + $0x28] sm:$0xff]  ;;  %v732_v18 = vld [vmem:[%s1102_s1 + $0x18] sm:$0xff]  ;;  %163 = vperm.xlu0 %638, %v149_v12   ;;  %v32_v20 = vpack.c.bf16 %v21_v16, %v20_v15  ;;  %v305_v42 = vsel %vm292_vm14, 1, %v644_v0  ;;  %vm296_vm0 = vcmp.eq.s32.totalorder %v685_v4, 1  ;;  %vm294_vm2 = vcmp.eq.s32.totalorder %v690_v5, 1 }
   0x6   :  { %v734_v19 = vpack.c.bf16 %v19_v14, %v18_v13  ;;  %v739_v21 = vld [vmem:[%s1102_s1 + $0x8] sm:$0xff]  ;;  %100 = vmatpush.bf16.msra.mxu0 %v625_v7  ;;  %vm141_vm4 = vcmp.eq.s32.totalorder %v727_v17, 0  ;;  %vm139_vm5 = vcmp.eq.s32.totalorder %v732_v18, 0  ;;  %v755_v25 = vld [vmem:[%s1102_s1 + $0x40] sm:$0xff]  ;;  %v760_v26 = vld [vmem:[%s1102_s1 + $0x38] sm:$0xff]  ;;  %vm295_vm1 = vcmp.eq.s32.totalorder %v732_v18, 1 }
   0x7   :  { %632 = vmatpush.bf16.msra.mxu3 %v625_v7  ;;  %634 = vmatpush.bf16.msra.mxu1 %v627_v8  ;;  %vm137_vm6 = vcmp.eq.s32.totalorder %v739_v21, 0  ;;  %v154_v22 = vsel %vm141_vm4, 1, %v644_v0  ;;  %v152_v23 = vsel %vm139_vm5, 1, %v644_v0  ;;  %v765_v27 = vld [vmem:[%s1102_s1 + $0x30] sm:$0xff]  ;;  %vm144_vm7 = vcmp.eq.s32.totalorder %v755_v25, 0  ;;  %v22_v31 = vld [vmem:[%s1103_s0 + $0x20] sm:$0xff] }
   0x8   :  { %636 = vmatpush.bf16.msra.mxu2 %v629_v9  ;;  %v150_v24 = vsel %vm137_vm6, 1, %v644_v0  ;;  %vm143_vm8 = vcmp.eq.s32.totalorder %v760_v26, 0  ;;  %vm142_vm9 = vcmp.eq.s32.totalorder %v765_v27, 0  ;;  %v157_v28 = vsel %vm144_vm7, 1, %v644_v0  ;;  %v23_v32 = vld [vmem:[%s1103_s0 + $0x28] sm:$0xff]  ;;  %v782_v33 = vld [vmem:[%s1102_s1 + $0x58] sm:$0xff] }
   0x9   :  { %578 = vmatmul.msk.bf16.vlgmr.msra.gmra.mxu0 %vm71_vm3, %v734_v19  ;;  %v156_v29 = vsel %vm143_vm8, 1, %v644_v0  ;;  %v155_v30 = vsel %vm142_vm9, 1, %v644_v0  ;;  %v787_v34 = vld [vmem:[%s1102_s1 + $0x50] sm:$0xff]  ;;  %v792_v35 = vld [vmem:[%s1102_s1 + $0x48] sm:$0xff]  ;;  %v33_v36 = vpack.c.bf16 %v23_v32, %v22_v31  ;;  %vm147_vm10 = vcmp.eq.s32.totalorder %v782_v33, 0  ;;  %v808_v40 = vld [vmem:[%s1102_s1 + $0x60] sm:$0xff] }
   0xa   :  { %255 = vmatpush.bf16.msrb.mxu0 %v628_v2  ;;  %579 = vmatmul.msk.bf16.vlgmr.msra.gmra.mxu3 %vm71_vm3, %v32_v20  ;;  %vm146_vm11 = vcmp.eq.s32.totalorder %v787_v34, 0  ;;  %vm145_vm12 = vcmp.eq.s32.totalorder %v792_v35, 0  ;;  %v160_v37 = vsel %vm147_vm10, 1, %v644_v0  ;;  %vm293_vm13 = vcmp.eq.s32.totalorder %v739_v21, 1  ;;  %v24_v44 = vld [vmem:[%s1103_s0 + $0x30] sm:$0xff]  ;;  %v25_v45 = vld [vmem:[%s1103_s0 + $0x38] sm:$0xff] }
   0xb   :  { %599 = vmatmul.msk.bf16.vlgmr.msra.gmra.mxu1 %vm71_vm3, %v32_v20  ;;  %619 = vmatmul.msk.bf16.vlgmr.msra.gmra.mxu2 %vm71_vm3, %v32_v20  ;;  %v159_v38 = vsel %vm146_vm11, 1, %v644_v0  ;;  %v158_v39 = vsel %vm145_vm12, 1, %v644_v0  ;;  %vm148_vm15 = vcmp.eq.s32.totalorder %v808_v40, 0  ;;  %v306_v41 = vsel %vm293_vm13, 1, %v644_v0  ;;  %v26_v53 = vld [vmem:[%s1103_s0 + $0x40] sm:$0xff]  ;;  %v27_v54 = vld [vmem:[%s1103_s0 + $0x48] sm:$0xff] }
   0xc   :  { %178 = vperm.xlu2 %640, %v154_v22   ;;  %v161_v43 = vsel %vm148_vm15, 1, %v644_v0  ;;  %v34_v46 = vpack.c.bf16 %v25_v45, %v24_v44  ;;  %v309_v47 = vsel %vm296_vm0, 1, %v644_v0  ;;  %v308_v48 = vsel %vm295_vm1, 1, %v644_v0  ;;  %v28_v62 = vld [vmem:[%s1103_s0 + $0x50] sm:$0xff]  ;;  %v29_v63 = vld [vmem:[%s1103_s0 + $0x58] sm:$0xff] }
   0xd   :  { %172 = vperm.xlu1 %639, %v152_v23   ;;  %166 = vperm.xlu0 %638, %v150_v24   ;;  %v307_v49 = vsel %vm294_vm2, 1, %v644_v0  ;;  %vm299_vm4 = vcmp.eq.s32.totalorder %v760_v26, 1  ;;  %vm298_vm5 = vcmp.eq.s32.totalorder %v765_v27, 1  ;;  %vm297_vm6 = vcmp.eq.s32.totalorder %v727_v17, 1  ;;  %v941_v44 = vld [vmem:[%s1104_s3] ss:$0 sm:$0xff] }
   0xe   :  { %256 = vmatpush.bf16.msrb.mxu0 %v627_v8  ;;  %v312_v50 = vsel %vm299_vm4, 1, %v644_v0  ;;  %v311_v51 = vsel %vm298_vm5, 1, %v644_v0  ;;  %v310_v52 = vsel %vm297_vm6, 1, %v644_v0  ;;  %v35_v55 = vpack.c.bf16 %v27_v54, %v26_v53 }
   0xf   :  { %vm302_vm7 = vcmp.eq.s32.totalorder %v787_v34, 1  ;;  %vm301_vm8 = vcmp.eq.s32.totalorder %v792_v35, 1  ;;  %vm300_vm9 = vcmp.eq.s32.totalorder %v755_v25, 1  ;;  %vm448_vm10 = vcmp.eq.s32.totalorder %v695_v6, 2 }
  0x10   :  { %v315_v56 = vsel %vm302_vm7, 1, %v644_v0  ;;  %v314_v57 = vsel %vm301_vm8, 1, %v644_v0  ;;  %v313_v58 = vsel %vm300_vm9, 1, %v644_v0  ;;  %vm304_vm11 = vcmp.eq.s32.totalorder %v808_v40, 1 }
  0x11   :  { %vm303_vm12 = vcmp.eq.s32.totalorder %v782_v33, 1  ;;  %v461_v59 = vsel %vm448_vm10, 1, %v644_v0  ;;  %v317_v60 = vsel %vm304_vm11, 1, %v644_v0  ;;  %v36_v1 = vpack.c.bf16 %v29_v63, %v28_v62 }
  0x12   :  { %411 = vmatpush.bf16.msra.mxu0 %v630_v3  ;;  %v316_v61 = vsel %vm303_vm12, 1, %v644_v0  ;;  %vm451_vm13 = vcmp.eq.s32.totalorder %v732_v18, 2  ;;  %vm450_vm14 = vcmp.eq.s32.totalorder %v690_v5, 2  ;;  %vm449_vm15 = vcmp.eq.s32.totalorder %v739_v21, 2 }
  0x13   :  { %v464_v2 = vsel %vm451_vm13, 1, %v644_v0  ;;  %v463_v3 = vsel %vm450_vm14, 1, %v644_v0  ;;  %v462_v6 = vsel %vm449_vm15, 1, %v644_v0  ;;  %vm454_vm0 = vcmp.eq.s32.totalorder %v765_v27, 2 }
  0x14   :  { %187 = vperm.xlu2 %640, %v157_v28   ;;  %vm453_vm1 = vcmp.eq.s32.totalorder %v727_v17, 2  ;;  %vm452_vm2 = vcmp.eq.s32.totalorder %v685_v4, 2  ;;  %v467_v5 = vsel %vm454_vm0, 1, %v644_v0  ;;  %vm457_vm4 = vcmp.eq.s32.totalorder %v792_v35, 2 }
  0x15   :  { %184 = vperm.xlu1 %639, %v156_v29   ;;  %181 = vperm.xlu0 %638, %v155_v30   ;;  %v466_v7 = vsel %vm453_vm1, 1, %v644_v0  ;;  %v465_v8 = vsel %vm452_vm2, 1, %v644_v0  ;;  %vm456_vm5 = vcmp.eq.s32.totalorder %v755_v25, 2  ;;  %vm455_vm6 = vcmp.eq.s32.totalorder %v760_v26, 2 }
  0x16   :  { %412 = vmatpush.bf16.msra.mxu0 %v629_v9  ;;  %v30_v9 = vld [vmem:[%s1103_s0 + $0x60] sm:$0xff]  ;;  %v470_v4 = vsel %vm457_vm4, 1, %v644_v0  ;;  %v469_v11 = vsel %vm456_vm5, 1, %v644_v0  ;;  %v468_v12 = vsel %vm455_vm6, 1, %v644_v0  ;;  %vm460_vm7 = vcmp.eq.s32.totalorder %v808_v40, 2 }
  0x17   :  { %v37_v10 = vpack.c.bf16 %v30_v9, %v30_v9  ;;  %vm459_vm8 = vcmp.eq.s32.totalorder %v782_v33, 2  ;;  %vm458_vm9 = vcmp.eq.s32.totalorder %v787_v34, 2  ;;  %v473_v14 = vsel %vm460_vm7, 1, %v644_v0 }
  0x18   :  { %v472_v15 = vsel %vm459_vm8, 1, %v644_v0  ;;  %v471_v16 = vsel %vm458_vm9, 1, %v644_v0  ;;  %vm552_vm14 = vcmask 523264  }
  0x19   :  { %598 = vmatmul.msk.bf16.vlgmr.msrb.gmra.mxu0 %vm71_vm3, %v734_v19 }
  0x1a   :  { %580 = vmatmul.msk.bf16.gmra.mxu3 %vm71_vm3, %v33_v36 }
  0x1b   :  { %600 = vmatmul.msk.bf16.gmra.mxu1 %vm71_vm3, %v33_v36  ;;  %620 = vmatmul.msk.bf16.gmra.mxu2 %vm71_vm3, %v33_v36 }
  0x1c   :  { %196 = vperm.xlu2 %640, %v160_v37  }
  0x1d   :  { %193 = vperm.xlu1 %639, %v159_v38   ;;  %190 = vperm.xlu0 %638, %v158_v39  }
  0x24   :  { %322 = vperm.xlu2 %640, %v306_v41  }
  0x25   :  { %319 = vperm.xlu1 %639, %v305_v42   ;;  %199 = vperm.xlu0 %638, %v161_v43   ;;  %v936_v43 = vld [vmem:[%s1104_s3 + $0x1] ss:$0 sm:$0xff] }
  0x29   :  { %618 = vmatmul.msk.bf16.vlgmr.msra.gmra.mxu0 %vm71_vm3, %v734_v19 }
  0x2a   :  { %581 = vmatmul.msk.bf16.gmra.mxu3 %vm71_vm3, %v34_v46 }
  0x2b   :  { %601 = vmatmul.msk.bf16.gmra.mxu1 %vm71_vm3, %v34_v46  ;;  %621 = vmatmul.msk.bf16.gmra.mxu2 %vm71_vm3, %v34_v46 }
  0x2c   :  { %331 = vperm.xlu2 %640, %v309_v47  }
  0x2d   :  { %328 = vperm.xlu1 %639, %v308_v48   ;;  %325 = vperm.xlu0 %638, %v307_v49  }
  0x34   :  { %340 = vperm.xlu2 %640, %v312_v50  }
  0x35   :  { %337 = vperm.xlu1 %639, %v311_v51   ;;  %334 = vperm.xlu0 %638, %v310_v52  }
  0x3a   :  { %582 = vmatmul.msk.bf16.gmra.mxu3 %vm71_vm3, %v35_v55 }
  0x3b   :  { %602 = vmatmul.msk.bf16.gmra.mxu1 %vm71_vm3, %v35_v55  ;;  %622 = vmatmul.msk.bf16.gmra.mxu2 %vm71_vm3, %v35_v55 }
  0x3c   :  { %349 = vperm.xlu2 %640, %v315_v56  }
  0x3d   :  { %346 = vperm.xlu1 %639, %v314_v57   ;;  %343 = vperm.xlu0 %638, %v313_v58   ;;  %v960_v58 = vld [vmem:[%s1104_s3 + $0x2] ss:$0 sm:$0xff] }
  0x44   :  { %475 = vperm.xlu2 %640, %v461_v59  }
  0x45   :  { %355 = vperm.xlu1 %639, %v317_v60   ;;  %352 = vperm.xlu0 %638, %v316_v61  }
  0x4a   :  { %583 = vmatmul.msk.bf16.gmra.mxu3 %vm71_vm3, %v36_v1 }
  0x4b   :  { %603 = vmatmul.msk.bf16.gmra.mxu1 %vm71_vm3, %v36_v1  ;;  %623 = vmatmul.msk.bf16.gmra.mxu2 %vm71_vm3, %v36_v1 }
  0x4c   :  { %484 = vperm.xlu2 %640, %v464_v2  }
  0x4d   :  { %481 = vperm.xlu1 %639, %v463_v3   ;;  %478 = vperm.xlu0 %638, %v462_v6  }
  0x54   :  { %493 = vperm.xlu2 %640, %v467_v5  }
  0x55   :  { %490 = vperm.xlu1 %639, %v466_v7   ;;  %487 = vperm.xlu0 %638, %v465_v8  }
  0x5a   :  { %584 = vmatmul.msk.bf16.gmra.mxu3 %vm71_vm3, %v37_v10 }
  0x5b   :  { %604 = vmatmul.msk.bf16.gmra.mxu1 %vm71_vm3, %v37_v10  ;;  %624 = vmatmul.msk.bf16.gmra.mxu2 %vm71_vm3, %v37_v10 }
  0x5c   :  { %502 = vperm.xlu2 %640, %v470_v4  }
  0x5d   :  { %499 = vperm.xlu1 %639, %v469_v11   ;;  %496 = vperm.xlu0 %638, %v468_v12  }
  0x5e   :  { %v176_v13 = vpop.permute.xlu2 %175 }
  0x5f   :  { %vm205_vm3 = vcmp.eq.s32.totalorder %v176_v13, 1 }
  0x64   :  { %511 = vperm.xlu2 %640, %v473_v14  }
  0x65   :  { %508 = vperm.xlu1 %639, %v472_v15   ;;  %505 = vperm.xlu0 %638, %v471_v16  }
  0x66   :  { %v899_v17 = vpop.permute.xlu2 %178 }
  0x6e   :  { %v901_v18 = vpop.permute.xlu2 %187 }
  0x76   :  { %v903_v19 = vpop.permute.xlu2 %196 }
  0x77   :  { %v905_v20 = vpop.permute.xlu1 %169  ;;  %v164_v21 = vpop.permute.xlu0 %163 }
  0x78   :  { %vm201_vm13 = vcmp.eq.s32.totalorder %v164_v21, 1  ;;  %vm203_vm9 = vcmp.eq.s32.totalorder %v905_v20, 1 }
  0x7e   :  { %v907_v23 = vpop.permute.xlu2 %322 }
  0x7f   :  { %v173_v22 = vpop.permute.xlu1 %172  ;;  %v909_v24 = vpop.permute.xlu0 %166 }
  0x80   :  { %vm204_vm12 = vcmp.eq.s32.totalorder %v173_v22, 1 }
  0x86   :  { %v332_v0 = vpop.permute.xlu2 %331  ;;  %v102_v27 = vpop.f32.mrf.mxu0 }
  0x87   :  { %v911_v25 = vpop.permute.xlu1 %184  ;;  %v913_v26 = vpop.permute.xlu0 %181  ;;  %vm361_vm10 = vcmp.eq.s32.totalorder %v332_v0, 1  ;;  %v103_v57 = vadd.f32 %v941_v44, %v102_v27 }
  0x88   :  { %v915_v28 = vpop.f32.mrf.mxu1  ;;  %vm207_vm2 = vcmp.eq.s32.totalorder %v913_v26, 1  ;;  %vm208_vm6 = vcmp.eq.s32.totalorder %v911_v25, 1 }
  0x89   :  { %v214_v8 = vsel %vm201_vm13, %v103_v57, 0.0  ;;  %vm206_vm13 = vcmp.eq.s32.totalorder %v899_v17, 1 }
  0x8d   :  { %v917_v29 = vpop.f32.mrf.mxu3 }
  0x8e   :  { %v919_v30 = vpop.f32.mrf.mxu2  ;;  %v923_v32 = vpop.permute.xlu2 %340 }
  0x8f   :  { %v921_v31 = vpop.permute.xlu1 %193  ;;  %v925_v33 = vpop.permute.xlu0 %190  ;;  %vm364_vm7 = vcmp.eq.s32.totalorder %v923_v32, 1  ;;  %v264_v32 = vadd.f32 %v936_v43, %v915_v28 }
  0x90   :  { %v927_v34 = vpop.f32.mrf.mxu0  ;;  %v265_v35 = vpop.f32.mrf.mxu1 }
  0x91   :  { %v266_v60 = vadd.f32 %v936_v43, %v265_v35 }
  0x95   :  { %v109_v36 = vpop.f32.mrf.mxu3 }
  0x96   :  { %v421_v37 = vpop.f32.mrf.mxu2  ;;  %v929_v38 = vpop.permute.xlu2 %349  ;;  %v110_v56 = vadd.f32 %v941_v44, %v109_v36 }
  0x97   :  { %v320_v39 = vpop.permute.xlu1 %319  ;;  %v931_v40 = vpop.permute.xlu0 %199  ;;  %v422_v1 = vadd.f32 %v960_v58, %v421_v37 }
  0x98   :  { %v258_v41 = vpop.f32.mrf.mxu0  ;;  %v268_v42 = vpop.f32.mrf.mxu1  ;;  %v217_v63 = vsel %vm204_vm12, %v110_v56, 0.0  ;;  %vm357_vm0 = vcmp.eq.s32.totalorder %v320_v39, 1 }
  0x99   :  { %v269_v45 = vadd.f32 %v936_v43, %v268_v42  ;;  %v259_v61 = vadd.f32 %v936_v43, %v258_v41 }
  0x9b   :  { %v370_v11 = vsel %vm357_vm0, %v259_v61, %v214_v8  ;;  %v108_v61 = vadd.f32 %v941_v44, %v917_v29  ;;  %vm210_vm0 = vcmp.eq.s32.totalorder %v925_v33, 1 }
  0x9d   :  { %v112_v46 = vpop.f32.mrf.mxu3  ;;  %v216_v29 = vsel %vm203_vm9, %v108_v61, 0.0 }
  0x9e   :  { %v113_v47 = vadd.f32 %v941_v44, %v112_v46  ;;  %v945_v48 = vpop.f32.mrf.mxu2  ;;  %v476_v49 = vpop.permute.xlu2 %475 }
  0x9f   :  { %v329_v50 = vpop.permute.xlu1 %328  ;;  %v947_v51 = vpop.permute.xlu0 %325  ;;  %vm513_vm1 = vcmp.eq.s32.totalorder %v476_v49, 1  ;;  %v425_v17 = vadd.f32 %v960_v58, %v945_v48 }
  0xa0   :  { %v218_v52 = vsel %vm205_vm3, %v113_v47, 0.0  ;;  %v949_v53 = vpop.f32.mrf.mxu0  ;;  %v953_v55 = vpop.f32.mrf.mxu1  ;;  %vm360_vm11 = vcmp.eq.s32.totalorder %v329_v50, 1  ;;  %vm359_vm8 = vcmp.eq.s32.totalorder %v947_v51, 1  ;;  %vm358_vm3 = vcmp.eq.s32.totalorder %v907_v23, 1 }
  0xa1   :  { %v951_v54 = vsel %vm361_vm10, %v269_v45, %v218_v52  ;;  %v373_v6 = vsel %vm360_vm11, %v266_v60, %v217_v63  ;;  %v261_v25 = vadd.f32 %v936_v43, %v949_v53  ;;  %vm202_vm10 = vcmp.eq.s32.totalorder %v909_v24, 1 }
  0xa5   :  { %v962_v59 = vpop.f32.mrf.mxu3 }
  0xa6   :  { %v966_v62 = vpop.f32.mrf.mxu2  ;;  %v485_v2 = vpop.permute.xlu2 %484  ;;  %v115_v20 = vadd.f32 %v941_v44, %v962_v59  ;;  %v271_v59 = vadd.f32 %v936_v43, %v953_v55 }
  0xa7   :  { %v338_v3 = vpop.permute.xlu1 %337  ;;  %vm516_vm15 = vcmp.eq.s32.totalorder %v485_v2, 1  ;;  %v969_v5 = vpop.permute.xlu0 %334 }
  0xa8   :  { %v414_v7 = vpop.f32.mrf.mxu0  ;;  %v529_v9 = vsel %vm516_vm15, %v422_v1, %v373_v6  ;;  %v273_v10 = vpop.f32.mrf.mxu1  ;;  %vm363_vm4 = vcmp.eq.s32.totalorder %v338_v3, 1  ;;  %v105_v1 = vadd.f32 %v941_v44, %v927_v34  ;;  %v420_v34 = vadd.f32 %v960_v58, %v919_v30 }
  0xa9   :  { %v415_v4 = vadd.f32 %v960_v58, %v414_v7  ;;  %v542_v12 = vmax.f32 %v529_v9, 0.0  ;;  %v274_v15 = vadd.f32 %v936_v43, %v273_v10  ;;  %v372_v7 = vsel %vm359_vm8, %v264_v32, %v216_v29 }
  0xaa   :  { %v215_v53 = vsel %vm202_vm10, %v105_v1, 0.0  ;;  %vm362_vm15 = vcmp.eq.s32.totalorder %v969_v5, 1  ;;  %v219_v30 = vsel %vm206_vm13, %v115_v20, 0.0  ;;  %vm367_vm8 = vcmp.eq.s32.totalorder %v929_v38, 1 }
  0xab   :  { %v526_v13 = vsel %vm513_vm1, %v415_v4, %v370_v11  ;;  %556 = vst.msk [vmem:[%s1105_s4 + $0x18] sm:$0xff] %vm552_vm14, %v542_v12  ;;  %v371_v9 = vsel %vm358_vm3, %v261_v25, %v215_v53 }
  0xac   :  { %v539_v14 = vmax.f32 %v526_v13, 0.0 }
  0xad   :  { %v117_v16 = vpop.f32.mrf.mxu3 }
  0xae   :  { %553 = vst.msk [vmem:[%s1105_s4] sm:$0xff] %vm552_vm14, %v539_v14  ;;  %v118_v21 = vadd.f32 %v941_v44, %v117_v16  ;;  %v429_v22 = vpop.f32.mrf.mxu2  ;;  %v494_v0 = vpop.permute.xlu2 %493  ;;  %v375_v14 = vsel %vm362_vm15, %v271_v59, %v219_v30 }
  0xaf   :  { %v983_v27 = vpop.permute.xlu1 %346  ;;  %v985_v35 = vpop.permute.xlu0 %343  ;;  %v430_v37 = vadd.f32 %v960_v58, %v429_v22  ;;  %vm519_vm5 = vcmp.eq.s32.totalorder %v494_v0, 1 }
  0xb0   :  { %v220_v36 = vsel %vm207_vm2, %v118_v21, 0.0  ;;  %v275_v41 = vpop.f32.mrf.mxu1  ;;  %v416_v63 = vpop.f32.mrf.mxu0  ;;  %vm366_vm1 = vcmp.eq.s32.totalorder %v983_v27, 1  ;;  %vm365_vm9 = vcmp.eq.s32.totalorder %v985_v35, 1 }
  0xb1   :  { %v376_v39 = vsel %vm363_vm4, %v274_v15, %v220_v36  ;;  %v276_v49 = vadd.f32 %v936_v43, %v275_v41  ;;  %v417_v3 = vadd.f32 %v960_v58, %v416_v63  ;;  %v427_v15 = vadd.f32 %v960_v58, %v966_v62 }
  0xb2   :  { %v532_v42 = vsel %vm519_vm5, %v430_v37, %v376_v39 }
  0xb3   :  { %v545_v45 = vmax.f32 %v532_v42, 0.0 }
  0xb5   :  { %559 = vst.msk [vmem:[%s1105_s4 + $0x30] sm:$0xff] %vm552_vm14, %v545_v45  ;;  %v119_v26 = vpop.f32.mrf.mxu3 }
  0xb6   :  { %v120_v46 = vadd.f32 %v941_v44, %v119_v26  ;;  %v993_v47 = vpop.f32.mrf.mxu2  ;;  %v503_v11 = vpop.permute.xlu2 %502 }
  0xb7   :  { %v997_v50 = vpop.permute.xlu1 %355  ;;  %v1000_v52 = vpop.permute.xlu0 %352  ;;  %vm522_vm2 = vcmp.eq.s32.totalorder %v503_v11, 1  ;;  %v432_v61 = vadd.f32 %v960_v58, %v993_v47 }
  0xb8   :  { %v221_v56 = vsel %vm208_vm6, %v120_v46, 0.0  ;;  %v278_v60 = vpop.f32.mrf.mxu1  ;;  %vm209_vm6 = vcmp.eq.s32.totalorder %v901_v18, 1 }
  0xb9   :  { %v1002_v57 = vsel %vm364_vm7, %v276_v49, %v221_v56  ;;  %v279_v45 = vadd.f32 %v936_v43, %v278_v60  ;;  %vm211_vm7 = vcmp.eq.s32.totalorder %v921_v31, 1 }
  0xbd   :  { %v122_v2 = vpop.f32.mrf.mxu3 }
  0xbe   :  { %v1015_v6 = vpop.f32.mrf.mxu2  ;;  %v123_v48 = vadd.f32 %v941_v44, %v122_v2 }
  0xbf   :  { %v482_v51 = vpop.permute.xlu1 %481  ;;  %v479_v28 = vpop.permute.xlu0 %478  ;;  %v435_v56 = vadd.f32 %v960_v58, %v1015_v6 }
  0xc0   :  { %vm515_vm11 = vcmp.eq.s32.totalorder %v482_v51, 1  ;;  %vm514_vm12 = vcmp.eq.s32.totalorder %v479_v28, 1  ;;  %v280_v10 = vpop.f32.mrf.mxu1  ;;  %v222_v26 = vsel %vm209_vm6, %v123_v48, 0.0 }
  0xc1   :  { %v528_v8 = vsel %vm515_vm11, %v420_v34, %v372_v7  ;;  %v527_v23 = vsel %vm514_vm12, %v417_v3, %v371_v9  ;;  %v281_v55 = vadd.f32 %v936_v43, %v280_v10  ;;  %v378_v63 = vsel %vm365_vm9, %v279_v45, %v222_v26 }
  0xc2   :  { %v541_v4 = vmax.f32 %v528_v8, 0.0  ;;  %v540_v24 = vmax.f32 %v527_v23, 0.0  ;;  %vm212_vm11 = vcmp.eq.s32.totalorder %v903_v19, 1  ;;  %vm368_vm12 = vcmp.eq.s32.totalorder %v1000_v52, 1 }
  0xc4   :  { %555 = vst.msk [vmem:[%s1105_s4 + $0x10] sm:$0xff] %vm552_vm14, %v541_v4 }
  0xc5   :  { %554 = vst.msk [vmem:[%s1105_s4 + $0x8] sm:$0xff] %vm552_vm14, %v540_v24  ;;  %v124_v12 = vpop.f32.mrf.mxu3  ;;  %v512_v24 = vpop.permute.xlu2 %511 }
  0xc6   :  { %v125_v5 = vadd.f32 %v941_v44, %v124_v12  ;;  %v436_v13 = vpop.f32.mrf.mxu2 }
  0xc7   :  { %v491_v16 = vpop.permute.xlu1 %490  ;;  %v488_v21 = vpop.permute.xlu0 %487  ;;  %v437_v33 = vadd.f32 %v960_v58, %v436_v13 }
  0xc8   :  { %vm518_vm4 = vcmp.eq.s32.totalorder %v491_v16, 1  ;;  %v223_v22 = vsel %vm210_vm0, %v125_v5, 0.0  ;;  %vm517_vm5 = vcmp.eq.s32.totalorder %v488_v21, 1  ;;  %v283_v37 = vpop.f32.mrf.mxu1  ;;  %vm213_vm0 = vcmp.eq.s32.totalorder %v931_v40, 1 }
  0xc9   :  { %v531_v0 = vsel %vm518_vm4, %v427_v15, %v375_v14  ;;  %v379_v36 = vsel %vm366_vm1, %v281_v55, %v223_v22  ;;  %v530_v62 = vsel %vm517_vm5, %v425_v17, %v951_v54  ;;  %v284_v54 = vadd.f32 %v936_v43, %v283_v37 }
  0xca   :  { %v544_v39 = vmax.f32 %v531_v0, 0.0  ;;  %v535_v41 = vsel %vm522_vm2, %v437_v33, %v379_v36  ;;  %v543_v27 = vmax.f32 %v530_v62, 0.0  ;;  %vm369_vm1 = vcmp.eq.s32.totalorder %v997_v50, 1 }
  0xcb   :  { %v548_v42 = vmax.f32 %v535_v41, 0.0  ;;  %vm525_vm2 = vcmp.eq.s32.totalorder %v512_v24, 1 }
  0xcc   :  { %558 = vst.msk [vmem:[%s1105_s4 + $0x28] sm:$0xff] %vm552_vm14, %v544_v39 }
  0xcd   :  { %557 = vst.msk [vmem:[%s1105_s4 + $0x20] sm:$0xff] %vm552_vm14, %v543_v27  ;;  %v127_v46 = vpop.f32.mrf.mxu3 }
  0xce   :  { %562 = vst.msk [vmem:[%s1105_s4 + $0x48] sm:$0xff] %vm552_vm14, %v548_v42  ;;  %v128_v18 = vadd.f32 %v941_v44, %v127_v46  ;;  %v439_v49 = vpop.f32.mrf.mxu2 }
  0xcf   :  { %v500_v60 = vpop.permute.xlu1 %499  ;;  %v497_v1 = vpop.permute.xlu0 %496  ;;  %v440_v51 = vadd.f32 %v960_v58, %v439_v49 }
  0xd0   :  { %vm521_vm3 = vcmp.eq.s32.totalorder %v500_v60, 1  ;;  %v224_v25 = vsel %vm211_vm7, %v128_v18, 0.0  ;;  %vm520_vm10 = vcmp.eq.s32.totalorder %v497_v1, 1  ;;  %v285_v32 = vpop.f32.mrf.mxu1 }
  0xd1   :  { %v534_v2 = vsel %vm521_vm3, %v435_v56, %v378_v63  ;;  %v380_v3 = vsel %vm367_vm8, %v284_v54, %v224_v25  ;;  %v533_v38 = vsel %vm520_vm10, %v432_v61, %v1002_v57  ;;  %v286_v34 = vadd.f32 %v936_v43, %v285_v32 }
  0xd2   :  { %v547_v31 = vmax.f32 %v534_v2, 0.0  ;;  %v546_v29 = vmax.f32 %v533_v38, 0.0 }
  0xd4   :  { %561 = vst.msk [vmem:[%s1105_s4 + $0x40] sm:$0xff] %vm552_vm14, %v547_v31 }
  0xd5   :  { %560 = vst.msk [vmem:[%s1105_s4 + $0x38] sm:$0xff] %vm552_vm14, %v546_v29  ;;  %v129_v35 = vpop.f32.mrf.mxu3 }
  0xd6   :  { %v130_v47 = vadd.f32 %v941_v44, %v129_v35  ;;  %v441_v6 = vpop.f32.mrf.mxu2 }
  0xd7   :  { %v509_v57 = vpop.permute.xlu1 %508  ;;  %v506_v53 = vpop.permute.xlu0 %505  ;;  %v442_v20 = vadd.f32 %v960_v58, %v441_v6 }
  0xd8   :  { %v225_v7 = vsel %vm212_vm11, %v130_v47, 0.0  ;;  %vm524_vm13 = vcmp.eq.s32.totalorder %v509_v57, 1  ;;  %vm523_vm15 = vcmp.eq.s32.totalorder %v506_v53, 1  ;;  %v288_v8 = vpop.f32.mrf.mxu1 }
  0xd9   :  { %v381_v28 = vsel %vm368_vm12, %v286_v34, %v225_v7  ;;  %v536_v9 = vsel %vm523_vm15, %v440_v51, %v380_v3  ;;  %v289_v19 = vadd.f32 %v936_v43, %v288_v8 }
  0xda   :  { %v537_v10 = vsel %vm524_vm13, %v442_v20, %v381_v28  ;;  %v549_v4 = vmax.f32 %v536_v9, 0.0 }
  0xdb   :  { %v550_v23 = vmax.f32 %v537_v10, 0.0 }
  0xdc   :  { %563 = vst.msk [vmem:[%s1105_s4 + $0x50] sm:$0xff] %vm552_vm14, %v549_v4 }
  0xdd   :  { %v132_v52 = vpop.f32.mrf.mxu3  ;;  %564 = vst.msk [vmem:[%s1105_s4 + $0x58] sm:$0xff] %vm552_vm14, %v550_v23 }
  0xde   :  { %v133_v30 = vadd.f32 %v941_v44, %v132_v52  ;;  %v444_v59 = vpop.f32.mrf.mxu2 }
  0xdf   :  { %v445_v12 = vadd.f32 %v960_v58, %v444_v59 }
  0xe0   :  { %v226_v11 = vsel %vm213_vm0, %v133_v30, 0.0  ;;  %v290_v43 = vpop.f32.mrf.mxu1 }
  0xe1   :  { %v382_v17 = vsel %vm369_vm1, %v289_v19, %v226_v11 }
  0xe2   :  { %v538_v5 = vsel %vm525_vm2, %v445_v12, %v382_v17 }
  0xe3   :  { %v551_v13 = vmax.f32 %v538_v5, 0.0 }
  0xe5   :  { %565 = vst.msk [vmem:[%s1105_s4 + $0x60] sm:$0xff] %vm552_vm14, %v551_v13  ;;  %v134_v14 = vpop.f32.mrf.mxu3 }
  0xe6   :  { %v446_v44 = vpop.f32.mrf.mxu2 }

</bundles_post_ra>
